<compile_context>
chip_gen: v7x
topology: tpu7x:2x2x1
jax: 0.10.0
libtpu: 0.0.40
codegen_flags: <defaults>
</compile_context>

<pallas_src>
import functools

import jax
import jax.numpy as jnp
from jax import lax
from jax.experimental import pallas as pl
from jax.experimental.pallas import tpu as pltpu


def _round_up(x, m):
    return (x + m - 1) // m * m


# ----------------------------- Pallas kernel ------------------------------ #
def _make_conv_bn_relu_kernel(taps, wp, dilation, cout_p, lout, relu):
    """Build the fused direct-conv kernel for one batch element.

    taps     : list of (kh, kw) kernel tap positions (static).
    wp       : padded image width (static) -> flat offset of a tap is
               dilation * (kh * wp + kw).
    cout_p   : padded output-channel count (sublane multiple).
    lout     : flattened-spatial output length (lane multiple of 128).
    relu     : static bool, apply ReLU in the epilogue.
    """

    def kernel(x_ref, w_ref, b_ref, o_ref):
        # x_ref: (1, Cin_p, Lin)   bf16  (padded plane, spatial flattened on lanes)
        # w_ref: (KH*KW, Cout_p, Cin_p) bf16 (BN scale folded in)
        # b_ref: (Cout_p, 1)       f32   (folded BN bias)
        # o_ref: (1, Cout_p, Lout) f32
        x = x_ref[0]                                  # single aligned VMEM load
        acc = jnp.zeros((cout_p, lout), jnp.float32)  # f32 accumulator (registers)
        # Fused im2col: each tap is a lane-shifted window of the resident
        # plane -> shifted matmul, accumulated in f32 on the MXU result path.
        for t, (kh, kw) in enumerate(taps):
            off = dilation * (kh * wp + kw)
            xs = x[:, off:off + lout]                 # lane shift, no HBM traffic
            acc = acc + jnp.dot(w_ref[t], xs,
                                preferred_element_type=jnp.float32)
        y = acc + b_ref[...]                          # (Cout_p,1) lane-broadcast, f32
        if relu:
            y = jnp.maximum(y, 0.0)
        o_ref[0] = y.astype(o_ref.dtype)              # lane-dense, unmasked stores

    return kernel


# ------------------------------ BasicConv --------------------------------- #
def basic_conv_forward(x_nchw, params, *, stride=1, padding=0, dilation=1,
                       groups=1, relu=True, bn=True, eps=1e-5):
    """Forward pass of BasicConv: conv2d(no bias) -> BN(eval) -> ReLU.

    x_nchw : (N, Cin, H, W) float32 (PyTorch layout)
    params : dict with 'w' (Cout, Cin, KH, KW) and, if bn, 'gamma', 'beta',
             'running_mean', 'running_var' (each (Cout,)).
    """
    assert groups == 1  # TODO(synk): grouped convolution not implemented
    w = params["w"].astype(jnp.float32)
    Cout, Cin, KH, KW = w.shape
    N, Cin_x, H, W = x_nchw.shape
    assert Cin == Cin_x

    OH = (H + 2 * padding - dilation * (KH - 1) - 1) // stride + 1
    OW = (W + 2 * padding - dilation * (KW - 1) - 1) // stride + 1
    Hp, Wp = H + 2 * padding, W + 2 * padding

    # Flattened-spatial geometry (spatial axis lives on TPU lanes).
    row_extent = (OH - 1) * stride + 1            # rows of the padded grid we keep
    col_extent = (OW - 1) * stride + 1
    max_off = dilation * ((KH - 1) * Wp + (KW - 1))
    Lout = _round_up(row_extent * Wp, 128)        # lane-dense output length
    Lin = _round_up(max(Hp * Wp, Lout + max_off), 128)
    Cin_p = _round_up(Cin, 8)
    Cout_p = _round_up(Cout, 8)

    # ---- fold BN (inference mode) into per-channel scale/bias ----
    if bn:
        scale = params["gamma"] / jnp.sqrt(params["running_var"] + eps)
        bias = params["beta"] - params["running_mean"] * scale
    else:
        scale = jnp.ones((Cout,), jnp.float32)
        bias = jnp.zeros((Cout,), jnp.float32)
    w_fold = w * scale[:, None, None, None].astype(jnp.float32)

    # weights: (Cout,Cin,KH,KW) -> (KH*KW, Cout_p, Cin_p) bf16, scale folded in
    w_k = jnp.transpose(w_fold, (2, 3, 0, 1)).reshape(KH * KW, Cout, Cin)
    w_k = jnp.pad(w_k, ((0, 0), (0, Cout_p - Cout), (0, Cin_p - Cin)))
    w_k = w_k.astype(jnp.bfloat16)
    b_k = jnp.pad(bias.astype(jnp.float32), (0, Cout_p - Cout)).reshape(Cout_p, 1)

    # input: pad spatially, flatten spatial, zero-pad channels/lanes, cast bf16
    xp = jnp.pad(x_nchw.astype(jnp.float32),
                 ((0, 0), (0, 0), (padding, padding), (padding, padding)))
    xf = xp.reshape(N, Cin, Hp * Wp)
    xf = jnp.pad(xf, ((0, 0), (0, Cin_p - Cin), (0, Lin - Hp * Wp)))
    xf = xf.astype(jnp.bfloat16)

    taps = [(kh, kw) for kh in range(KH) for kw in range(KW)]
    kernel = _make_conv_bn_relu_kernel(taps, Wp, dilation, Cout_p, Lout, relu)

    # VMEM budget (double-buffered in/out blocks) + margin.
    per_step = (Cin_p * Lin * 2            # input plane (bf16)
                + KH * KW * Cout_p * Cin_p * 2  # weights (bf16)
                + Cout_p * 4               # bias (f32)
                + Cout_p * Lout * 4)       # output tile (f32)
    vmem_budget = 2 * per_step + (1 << 20)
    # TODO(synk): for plane sizes beyond this, tile the flattened spatial axis
    #             with a halo (manual DMA / pl.ANY) instead of asserting.
    assert vmem_budget <= (32 << 20), "per-batch plane too large for single-tile kernel"
    vmem_limit = int(min(max(vmem_budget, 8 << 20), 32 << 20))

    out = pl.pallas_call(
        kernel,
        out_shape=jax.ShapeDtypeStruct((N, Cout_p, Lout), jnp.float32),
        grid_spec=pltpu.PrefetchScalarGridSpec(
            num_scalar_prefetch=0,
            grid=(N,),
            in_specs=[
                pl.BlockSpec((1, Cin_p, Lin), lambda n: (n, 0, 0)),        # input plane
                pl.BlockSpec((KH * KW, Cout_p, Cin_p), lambda n: (0, 0, 0)),  # weights
                pl.BlockSpec((Cout_p, 1), lambda n: (0, 0)),               # BN bias
            ],
            out_specs=pl.BlockSpec((1, Cout_p, Lout), lambda n: (n, 0, 0)),
        ),
        compiler_params=pltpu.CompilerParams(
            dimension_semantics=("parallel",),   # N>=2 steps -> both v7x TCs busy
            vmem_limit_bytes=vmem_limit,
        ),
    )(xf, w_k, b_k)

    # Crop the padded flat grid back to (N, Cout, OH, OW) -- already NCHW.
    y = out[:, :Cout, :row_extent * Wp].reshape(N, Cout, row_extent, Wp)
    y = y[:, :, ::stride, :col_extent:stride]
    return y


# ------------------------------ reference --------------------------------- #
def _reference(x_nchw, params, *, stride, padding, eps=1e-5):
    y = lax.conv_general_dilated(
        x_nchw.astype(jnp.float32),
        params["w"].astype(jnp.float32),
        window_strides=(stride, stride),
        padding=[(padding, padding), (padding, padding)],
        dimension_numbers=("NCHW", "OIHW", "NCHW"),
    )
    scale = params["gamma"] / jnp.sqrt(params["running_var"] + eps)
    bias = params["beta"] - params["running_mean"] * scale
    y = y * scale[None, :, None, None] + bias[None, :, None, None]
    return jnp.maximum(y, 0.0)


# --------------------------------- main ------------------------------------ #
if __name__ == "__main__":
    # BasicConv(in_planes=4, out_planes=8, kernel_size=3, stride=1, padding=1)
    N, Cin, H, W = 2, 4, 16, 16
    Cout, KH, KW = 8, 3, 3
    stride, padding = 1, 1

    key = jax.random.PRNGKey(0)
    kx, kw, kg, kb, km, kv = jax.random.split(key, 6)

    x = jax.random.normal(kx, (N, Cin, H, W), dtype=jnp.float32)
    params = {
        "w": 0.1 * jax.random.normal(kw, (Cout, Cin, KH, KW), dtype=jnp.float32),
        "gamma": 1.0 + 0.1 * jax.random.normal(kg, (Cout,), dtype=jnp.float32),
        "beta": 0.1 * jax.random.normal(kb, (Cout,), dtype=jnp.float32),
        "running_mean": 0.1 * jax.random.normal(km, (Cout,), dtype=jnp.float32),
        "running_var": jnp.abs(1.0 + 0.1 * jax.random.normal(kv, (Cout,), dtype=jnp.float32)),
    }

    fwd = jax.jit(functools.partial(basic_conv_forward, stride=stride, padding=padding))
    out = fwd(x, params)
    out = jax.block_until_ready(out)

    ref = _reference(x, params, stride=stride, padding=padding)
    assert out.shape == (N, Cout, H, W), out.shape
    # bf16 matmul operands -> relaxed tolerance vs. the f32 reference.
    assert jnp.allclose(out, ref, atol=2e-2, rtol=2e-2), float(jnp.max(jnp.abs(out - ref)))

    print("KERNEL_OK")
</pallas_src>

<mosaic_0001>
module attributes {stable_mosaic.version = 11 : i64} {
  func.func @kernel(%arg0: i32, %arg1: memref<1x8x512xbf16, #tpu.memory_space<vmem>>, %arg2: memref<9x8x8xbf16, #tpu.memory_space<vmem>>, %arg3: memref<8x1xf32, #tpu.memory_space<vmem>>, %arg4: memref<1x8x384xf32, #tpu.memory_space<vmem>>) attributes {dimension_semantics = [#tpu.dimension_semantics<parallel>], iteration_bounds = array<i64: 2>, scalar_prefetch = 0 : i64, scratch_operands = 0 : i64, tpu.core_type = #tpu.core_type<tc>, window_params = [{transform_indices = @transform_0, window_bounds = array<i64: 1, 8, 512>}, {pipeline_mode = #tpu.pipeline_mode<synchronous>, transform_indices = @transform_1, window_bounds = array<i64: 9, 8, 8>}, {pipeline_mode = #tpu.pipeline_mode<synchronous>, transform_indices = @transform_2, window_bounds = array<i64: 8, 1>}, {transform_indices = @transform_3, window_bounds = array<i64: 1, 8, 384>}]} {
    %c0 = arith.constant 0 : index
    %c0_0 = arith.constant 0 : index
    %c0_1 = arith.constant 0 : index
    %0 = vector.load %arg1[%c0, %c0_0, %c0_1] : memref<1x8x512xbf16, #tpu.memory_space<vmem>>, vector<1x8x512xbf16>
    %1 = vector.shape_cast %0 : vector<1x8x512xbf16> to vector<8x512xbf16>
    %cst = arith.constant 0.000000e+00 : f32
    %2 = vector.broadcast %cst : f32 to vector<8x384xf32>
    %3 = vector.extract_strided_slice %1 {offsets = [0, 0], sizes = [8, 384], strides = [1, 1]} : vector<8x512xbf16> to vector<8x384xbf16>
    %c0_2 = arith.constant 0 : index
    %c0_3 = arith.constant 0 : index
    %c0_4 = arith.constant 0 : index
    %4 = vector.load %arg2[%c0_2, %c0_3, %c0_4] : memref<9x8x8xbf16, #tpu.memory_space<vmem>>, vector<1x8x8xbf16>
    %5 = vector.shape_cast %4 : vector<1x8x8xbf16> to vector<8x8xbf16>
    %cst_5 = arith.constant dense<0.000000e+00> : vector<8x384xf32>
    %6 = tpu.matmul %5, %3, %cst_5 {dimension_numbers = #tpu.dot_dimension_numbers<[1], [0], [0], [1], [0, 0, 1, 1], [], []>} : vector<8x8xbf16>, vector<8x384xbf16>, vector<8x384xf32> -> vector<8x384xf32>
    %7 = arith.addf %2, %6 : vector<8x384xf32>
    %8 = vector.extract_strided_slice %1 {offsets = [0, 1], sizes = [8, 384], strides = [1, 1]} : vector<8x512xbf16> to vector<8x384xbf16>
    %c1 = arith.constant 1 : index
    %c0_6 = arith.constant 0 : index
    %c0_7 = arith.constant 0 : index
    %9 = vector.load %arg2[%c1, %c0_6, %c0_7] : memref<9x8x8xbf16, #tpu.memory_space<vmem>>, vector<1x8x8xbf16>
    %10 = vector.shape_cast %9 : vector<1x8x8xbf16> to vector<8x8xbf16>
    %cst_8 = arith.constant dense<0.000000e+00> : vector<8x384xf32>
    %11 = tpu.matmul %10, %8, %cst_8 {dimension_numbers = #tpu.dot_dimension_numbers<[1], [0], [0], [1], [0, 0, 1, 1], [], []>} : vector<8x8xbf16>, vector<8x384xbf16>, vector<8x384xf32> -> vector<8x384xf32>
    %12 = arith.addf %7, %11 : vector<8x384xf32>
    %13 = vector.extract_strided_slice %1 {offsets = [0, 2], sizes = [8, 384], strides = [1, 1]} : vector<8x512xbf16> to vector<8x384xbf16>
    %c2 = arith.constant 2 : index
    %c0_9 = arith.constant 0 : index
    %c0_10 = arith.constant 0 : index
    %14 = vector.load %arg2[%c2, %c0_9, %c0_10] : memref<9x8x8xbf16, #tpu.memory_space<vmem>>, vector<1x8x8xbf16>
    %15 = vector.shape_cast %14 : vector<1x8x8xbf16> to vector<8x8xbf16>
    %cst_11 = arith.constant dense<0.000000e+00> : vector<8x384xf32>
    %16 = tpu.matmul %15, %13, %cst_11 {dimension_numbers = #tpu.dot_dimension_numbers<[1], [0], [0], [1], [0, 0, 1, 1], [], []>} : vector<8x8xbf16>, vector<8x384xbf16>, vector<8x384xf32> -> vector<8x384xf32>
    %17 = arith.addf %12, %16 : vector<8x384xf32>
    %18 = vector.extract_strided_slice %1 {offsets = [0, 18], sizes = [8, 384], strides = [1, 1]} : vector<8x512xbf16> to vector<8x384xbf16>
    %c3 = arith.constant 3 : index
    %c0_12 = arith.constant 0 : index
    %c0_13 = arith.constant 0 : index
    %19 = vector.load %arg2[%c3, %c0_12, %c0_13] : memref<9x8x8xbf16, #tpu.memory_space<vmem>>, vector<1x8x8xbf16>
    %20 = vector.shape_cast %19 : vector<1x8x8xbf16> to vector<8x8xbf16>
    %cst_14 = arith.constant dense<0.000000e+00> : vector<8x384xf32>
    %21 = tpu.matmul %20, %18, %cst_14 {dimension_numbers = #tpu.dot_dimension_numbers<[1], [0], [0], [1], [0, 0, 1, 1], [], []>} : vector<8x8xbf16>, vector<8x384xbf16>, vector<8x384xf32> -> vector<8x384xf32>
    %22 = arith.addf %17, %21 : vector<8x384xf32>
    %23 = vector.extract_strided_slice %1 {offsets = [0, 19], sizes = [8, 384], strides = [1, 1]} : vector<8x512xbf16> to vector<8x384xbf16>
    %c4 = arith.constant 4 : index
    %c0_15 = arith.constant 0 : index
    %c0_16 = arith.constant 0 : index
    %24 = vector.load %arg2[%c4, %c0_15, %c0_16] : memref<9x8x8xbf16, #tpu.memory_space<vmem>>, vector<1x8x8xbf16>
    %25 = vector.shape_cast %24 : vector<1x8x8xbf16> to vector<8x8xbf16>
    %cst_17 = arith.constant dense<0.000000e+00> : vector<8x384xf32>
    %26 = tpu.matmul %25, %23, %cst_17 {dimension_numbers = #tpu.dot_dimension_numbers<[1], [0], [0], [1], [0, 0, 1, 1], [], []>} : vector<8x8xbf16>, vector<8x384xbf16>, vector<8x384xf32> -> vector<8x384xf32>
    %27 = arith.addf %22, %26 : vector<8x384xf32>
    %28 = vector.extract_strided_slice %1 {offsets = [0, 20], sizes = [8, 384], strides = [1, 1]} : vector<8x512xbf16> to vector<8x384xbf16>
    %c5 = arith.constant 5 : index
    %c0_18 = arith.constant 0 : index
    %c0_19 = arith.constant 0 : index
    %29 = vector.load %arg2[%c5, %c0_18, %c0_19] : memref<9x8x8xbf16, #tpu.memory_space<vmem>>, vector<1x8x8xbf16>
    %30 = vector.shape_cast %29 : vector<1x8x8xbf16> to vector<8x8xbf16>
    %cst_20 = arith.constant dense<0.000000e+00> : vector<8x384xf32>
    %31 = tpu.matmul %30, %28, %cst_20 {dimension_numbers = #tpu.dot_dimension_numbers<[1], [0], [0], [1], [0, 0, 1, 1], [], []>} : vector<8x8xbf16>, vector<8x384xbf16>, vector<8x384xf32> -> vector<8x384xf32>
    %32 = arith.addf %27, %31 : vector<8x384xf32>
    %33 = vector.extract_strided_slice %1 {offsets = [0, 36], sizes = [8, 384], strides = [1, 1]} : vector<8x512xbf16> to vector<8x384xbf16>
    %c6 = arith.constant 6 : index
    %c0_21 = arith.constant 0 : index
    %c0_22 = arith.constant 0 : index
    %34 = vector.load %arg2[%c6, %c0_21, %c0_22] : memref<9x8x8xbf16, #tpu.memory_space<vmem>>, vector<1x8x8xbf16>
    %35 = vector.shape_cast %34 : vector<1x8x8xbf16> to vector<8x8xbf16>
    %cst_23 = arith.constant dense<0.000000e+00> : vector<8x384xf32>
    %36 = tpu.matmul %35, %33, %cst_23 {dimension_numbers = #tpu.dot_dimension_numbers<[1], [0], [0], [1], [0, 0, 1, 1], [], []>} : vector<8x8xbf16>, vector<8x384xbf16>, vector<8x384xf32> -> vector<8x384xf32>
    %37 = arith.addf %32, %36 : vector<8x384xf32>
    %38 = vector.extract_strided_slice %1 {offsets = [0, 37], sizes = [8, 384], strides = [1, 1]} : vector<8x512xbf16> to vector<8x384xbf16>
    %c7 = arith.constant 7 : index
    %c0_24 = arith.constant 0 : index
    %c0_25 = arith.constant 0 : index
    %39 = vector.load %arg2[%c7, %c0_24, %c0_25] : memref<9x8x8xbf16, #tpu.memory_space<vmem>>, vector<1x8x8xbf16>
    %40 = vector.shape_cast %39 : vector<1x8x8xbf16> to vector<8x8xbf16>
    %cst_26 = arith.constant dense<0.000000e+00> : vector<8x384xf32>
    %41 = tpu.matmul %40, %38, %cst_26 {dimension_numbers = #tpu.dot_dimension_numbers<[1], [0], [0], [1], [0, 0, 1, 1], [], []>} : vector<8x8xbf16>, vector<8x384xbf16>, vector<8x384xf32> -> vector<8x384xf32>
    %42 = arith.addf %37, %41 : vector<8x384xf32>
    %43 = vector.extract_strided_slice %1 {offsets = [0, 38], sizes = [8, 384], strides = [1, 1]} : vector<8x512xbf16> to vector<8x384xbf16>
    %c8 = arith.constant 8 : index
    %c0_27 = arith.constant 0 : index
    %c0_28 = arith.constant 0 : index
    %44 = vector.load %arg2[%c8, %c0_27, %c0_28] : memref<9x8x8xbf16, #tpu.memory_space<vmem>>, vector<1x8x8xbf16>
    %45 = vector.shape_cast %44 : vector<1x8x8xbf16> to vector<8x8xbf16>
    %cst_29 = arith.constant dense<0.000000e+00> : vector<8x384xf32>
    %46 = tpu.matmul %45, %43, %cst_29 {dimension_numbers = #tpu.dot_dimension_numbers<[1], [0], [0], [1], [0, 0, 1, 1], [], []>} : vector<8x8xbf16>, vector<8x384xbf16>, vector<8x384xf32> -> vector<8x384xf32>
    %47 = arith.addf %42, %46 : vector<8x384xf32>
    %c0_30 = arith.constant 0 : index
    %c0_31 = arith.constant 0 : index
    %48 = vector.load %arg3[%c0_30, %c0_31] : memref<8x1xf32, #tpu.memory_space<vmem>>, vector<8x1xf32>
    %49 = vector.broadcast %48 : vector<8x1xf32> to vector<8x384xf32>
    %50 = arith.addf %47, %49 : vector<8x384xf32>
    %cst_32 = arith.constant 0.000000e+00 : f32
    %51 = vector.broadcast %cst_32 : f32 to vector<8x384xf32>
    %52 = arith.maximumf %50, %51 : vector<8x384xf32>
    %c0_33 = arith.constant 0 : index
    %c0_34 = arith.constant 0 : index
    %c0_35 = arith.constant 0 : index
    %53 = vector.load %arg4[%c0_33, %c0_34, %c0_35] : memref<1x8x384xf32, #tpu.memory_space<vmem>>, vector<1x8x384xf32>
    %54 = vector.shape_cast %53 : vector<1x8x384xf32> to vector<8x384xf32>
    %55 = vector.shape_cast %52 : vector<8x384xf32> to vector<1x8x384xf32>
    tpu.vector_store %arg4[%c0_33, %c0_34, %c0_35], %55 {strides = array<i32>} : memref<1x8x384xf32, #tpu.memory_space<vmem>>, vector<1x8x384xf32>,
    return
  }
  func.func @transform_0(%arg0: i32) -> (i32, i32, i32) {
    %c0_i32 = arith.constant 0 : i32
    %c0_i32_0 = arith.constant 0 : i32
    %c0_i32_1 = arith.constant 0 : i32
    return %arg0, %c0_i32, %c0_i32_0 : i32, i32, i32
  }
  func.func @transform_1(%arg0: i32) -> (i32, i32, i32) {
    %c0_i32 = arith.constant 0 : i32
    %c0_i32_0 = arith.constant 0 : i32
    %c0_i32_1 = arith.constant 0 : i32
    %c0_i32_2 = arith.constant 0 : i32
    return %c0_i32, %c0_i32_0, %c0_i32_1 : i32, i32, i32
  }
  func.func @transform_2(%arg0: i32) -> (i32, i32) {
    %c0_i32 = arith.constant 0 : i32
    %c0_i32_0 = arith.constant 0 : i32
    %c0_i32_1 = arith.constant 0 : i32
    return %c0_i32, %c0_i32_0 : i32, i32
  }
  func.func @transform_3(%arg0: i32) -> (i32, i32, i32) {
    %c0_i32 = arith.constant 0 : i32
    %c0_i32_0 = arith.constant 0 : i32
    %c0_i32_1 = arith.constant 0 : i32
    return %arg0, %c0_i32, %c0_i32_0 : i32, i32, i32
  }
}

</mosaic_0001>

<bundles_post_ra>
// kernel: basic_conv_forward.1
= control target key start
LH: loop header
LB: loop body
LE: loop exit
PB: predicated region body
PF: predicated region fallthrough
CT: control target
= control target key end

     0   :  { %s1413_s12 = smov 0   ;;  %s1568_s0 = inlined_call_operand.vmem [shape: bf16[2,8,512], index: 0, kind: input, shape index: {}]   ;;  %s1569_s1 = inlined_call_operand.vmem [shape: bf16[9,8,8], index: 1, kind: input, shape index: {}]   ;;  %s1570_s2 = inlined_call_operand.vmem [shape: f32[8,1], index: 2, kind: input, shape index: {}]   ;;  %s1571_s3 = inlined_call_operand.vmem [shape: f32[2,8,384], index: 3, kind: output, shape index: {}]  }
   0x1 LB: > { %s1227_s13 = sadd.s32 4294967295, %s1380_s12   ;;  %p1231_p0 = scmp.ge.s32.totalorder %s1380_s12, 1  ;;  %s1380_s12 = sphi %s1413_s12, %s13_s12  }
   0x2   : > { %p137_p1 = scmp.lt.s32.totalorder %s1380_s12, 3 }
   0x4   : > { %p138_p2 = pnand %p1231_p0, %p137_p1 }
   0x5   : > { %p161_p3 = scmp.lt.s32.totalorder (!%p138_p2), %s1227_s13, 1  ;;  %v1382_v0 = vmov (!%p138_p2), 0.0   ;;  %v1383_v1 = vmov (!%p138_p2), 0   ;;  %vm1384_vm0 = vmmov (!%p138_p2), 0   ;;  %s1385_s18 = smov (!%p138_p2), 127   ;;  %v1157_v8 = vld [vmem:[%s1570_s2] sm:$0xff] (!%p138_p2) }
   0x6   : > { %141 = sbr.rel (%p138_p2) target bundleno = 427 (0x1ab), region = 32  ;;  %1295 = vmatprep.subr.bf16.mxu1 (!%p138_p2), %v1382_v0  ;;  %245 = vmatprep.mubr.bf16.mxu0 (!%p138_p2), %v1383_v1  ;;  %s1386_s19 = smov (!%p138_p2), 126   ;;  %vm195_vm1 = vcmask (!%p138_p2), 1039360   ;;  %vm203_vm2 = vcmask (!%p138_p2), 1043456   ;;  %v1235_v18 = vld [vmem:[%s1569_s1 + $0x4] sm:$0xf] (!%p138_p2) }
   0x7   : > { %1297 = vmatprep.mubr.msk.bf16.mxu1 (!%p138_p2), %vm1384_vm0, %v1382_v0  ;;  %1369 = vset.pattern.permute.xlu0 (!%p138_p2), %v1383_v1  ;;  %s1387_s20 = smov (!%p138_p2), 110   ;;  %s1388_s21 = smov (!%p138_p2), 109   ;;  %vm199_vm3 = vcmask (!%p138_p2), 64512   ;;  %vm397_vm4 = vcmask (!%p138_p2), 1031168   ;;  %v174_v28 = vld [vmem:[%s1569_s1] sm:$0xf] (!%p138_p2) }
   0x8   : > { %s1389_s22 = smov (!%p138_p2), 108   ;;  %s1390_s23 = smov (!%p138_p2), 92   ;;  %vm507_vm5 = vcmask (!%p138_p2), 900096   ;;  %v1246_v38 = vld [vmem:[%s1569_s1 + $0x8] sm:$0xf] (!%p138_p2)  ;;  %vm617_vm6 = vcmask (!%p138_p2), 891904  }
   0x9   : > { %s1391_s24 = smov (!%p138_p2), 91   ;;  %s1392_s25 = smov (!%p138_p2), 90   ;;  %v1250_v48 = vld [vmem:[%s1569_s1 + $0xc] sm:$0xf] (!%p138_p2)  ;;  %vm727_vm7 = vcmask (!%p138_p2), 883712   ;;  %vm837_vm8 = vcmask (!%p138_p2), 752640  }
   0xa   : > { %v1254_v58 = vld [vmem:[%s1569_s1 + $0x10] sm:$0xf] (!%p138_p2)  ;;  %vm947_vm9 = vcmask (!%p138_p2), 744448   ;;  %vm1057_vm10 = vcmask (!%p138_p2), 736256  }
   0xd   : > { %s1573_s13 = smov (!%p161_p3, %s1227_s13), 1 }
   0xe   : > { %s1276_s14 = sshll.u32 %s1573_s13, 4 }
   0xf   : > { %s165_s17 = scalar_lea.vmem %s1568_s0, %s1276_s14 }
  0x10   : > { %v173_v2 = vld [vmem:[%s165_s17 + $0x8] sm:$0xff]  ;;  %v172_v3 = vld [vmem:[%s165_s17] sm:$0xff] }
  0x11   : > { %v1432_v4 = vcombine.low %v173_v2, %v173_v2  ;;  %v1434_v5 = vcombine.low %v172_v3, %v172_v3  ;;  %v1239_v6 = vcombine.high %v173_v2, %v173_v2  ;;  %v1237_v7 = vcombine.high %v172_v3, %v172_v3 }
  0x13   : > { %191 = vrot.lane.b32.xlu1 %v1432_v4, %s1385_s18  ;;  %187 = vrot.lane.b32.xlu0 %v1434_v5, %s1385_s18  ;;  %v298_v20 = vsel %vm203_vm2, %v1434_v5, 0  ;;  %v304_v21 = vsel %vm203_vm2, %v1432_v4, 0 }
  0x17   : > { %193 = vrot.lane.b32.xlu1 %v1239_v6, %s1385_s18  ;;  %189 = vrot.lane.b32.xlu0 %v1237_v7, %s1385_s18 }
  0x1b   : > { %389 = vrot.lane.b32.xlu0 %v1434_v5, %s1386_s19  ;;  %391 = vrot.lane.b32.xlu1 %v1237_v7, %s1386_s19 }
  0x1f   : > { %393 = vrot.lane.b32.xlu0 %v1432_v4, %s1386_s19  ;;  %395 = vrot.lane.b32.xlu1 %v1239_v6, %s1386_s19 }
  0x23   : > { %499 = vrot.lane.b32.xlu0 %v1434_v5, %s1387_s20  ;;  %501 = vrot.lane.b32.xlu1 %v1237_v7, %s1387_s20 }
  0x27   : > { %503 = vrot.lane.b32.xlu0 %v1432_v4, %s1387_s20  ;;  %505 = vrot.lane.b32.xlu1 %v1239_v6, %s1387_s20 }
  0x2b   : > { %609 = vrot.lane.b32.xlu0 %v1434_v5, %s1388_s21  ;;  %611 = vrot.lane.b32.xlu1 %v1237_v7, %s1388_s21 }
  0x2f   : > { %613 = vrot.lane.b32.xlu0 %v1432_v4, %s1388_s21  ;;  %615 = vrot.lane.b32.xlu1 %v1239_v6, %s1388_s21  ;;  %s1349_s21 = smul.u32 24, %s1573_s13 }
  0x33   : > { %719 = vrot.lane.b32.xlu0 %v1434_v5, %s1389_s22  ;;  %721 = vrot.lane.b32.xlu1 %v1237_v7, %s1389_s22 }
  0x37   : > { %723 = vrot.lane.b32.xlu0 %v1432_v4, %s1389_s22  ;;  %725 = vrot.lane.b32.xlu1 %v1239_v6, %s1389_s22 }
  0x3b   : > { %829 = vrot.lane.b32.xlu0 %v1434_v5, %s1390_s23  ;;  %831 = vrot.lane.b32.xlu1 %v1237_v7, %s1390_s23 }
  0x3f   : > { %833 = vrot.lane.b32.xlu0 %v1432_v4, %s1390_s23  ;;  %835 = vrot.lane.b32.xlu1 %v1239_v6, %s1390_s23 }
  0x43   : > { %939 = vrot.lane.b32.xlu0 %v1434_v5, %s1391_s24  ;;  %941 = vrot.lane.b32.xlu1 %v1237_v7, %s1391_s24 }
  0x47   : > { %943 = vrot.lane.b32.xlu0 %v1432_v4, %s1391_s24  ;;  %945 = vrot.lane.b32.xlu1 %v1239_v6, %s1391_s24  ;;  %s170_s24 = scalar_lea.vmem %s1571_s3, %s1349_s21 }
  0x4b   : > { %1049 = vrot.lane.b32.xlu0 %v1434_v5, %s1392_s25  ;;  %1051 = vrot.lane.b32.xlu1 %v1237_v7, %s1392_s25 }
  0x4f   : > { %1053 = vrot.lane.b32.xlu0 %v1432_v4, %s1392_s25  ;;  %1055 = vrot.lane.b32.xlu1 %v1239_v6, %s1392_s25  ;;  %v1258_v6 = vld [vmem:[%s1569_s1 + $0x14] sm:$0xf] }
  0x53   : > { %1160 = vperm.xlu0 %1369, %v1157_v8  }
  0x85   : > { %v192_v9 = vpop.permute.xlu1 %191  ;;  %v188_v10 = vpop.permute.xlu0 %187 }
  0x89   : > { %v194_v11 = vpop.permute.xlu1 %193  ;;  %v190_v12 = vpop.permute.xlu0 %189 }
  0x8a   : > { %v197_v13 = vsel %vm195_vm1, %v190_v12, %v192_v9  ;;  %v196_v14 = vsel %vm195_vm1, %v188_v10, %v190_v12  ;;  %v198_v15 = vsel %vm195_vm1, %v192_v9, %v194_v11 }
  0x8b   : > { %1240 = vmatprep.subr.msk.bf16.mxu0 %vm203_vm2, %v197_v13  ;;  %v205_v16 = vsel %vm203_vm2, %v196_v14, 0  ;;  %v211_v17 = vsel %vm203_vm2, %v198_v15, 0 }
  0x8c   : > { %214 = vmatpush1.bf16.msra.mxu0 %v205_v16  ;;  %1296 = vmatpush3.bf16.msra.mxu1 %v211_v17  ;;  %v1262_v16 = vld [vmem:[%s1569_s1 + $0x18] sm:$0xf] }
  0x8d   : > { %v390_v19 = vpop.permute.xlu0 %389  ;;  %1243 = vmatprep.subr.msk.bf16.mxu0 %vm203_vm2, %v1237_v7  ;;  %1301 = vmatprep.subr.bf16.mxu1 %v1382_v0  ;;  %v392_v22 = vpop.permute.xlu1 %391 }
  0x8e   : > { %v398_v25 = vsel %vm397_vm4, %v390_v19, %v392_v22 }
  0x8f   : > { %1241 = vmatmul.mubr.msk.bf16.vlgmr.msra.gmra.mrb[0].mxu0 %vm199_vm3, %v1235_v18  ;;  %1298 = vmatmul.mubr.msk.bf16.vlgmr.msra.gmra.mrb[0].mxu1 %vm199_vm3, %v1235_v18  ;;  %v405_v29 = vsel %vm203_vm2, %v398_v25, 0 }
  0x90   : > { %307 = vmatpush1.bf16.msra.mxu0 %v298_v20  ;;  %1302 = vmatpush3.bf16.msra.mxu1 %v304_v21 }
  0x91   : > { %v394_v23 = vpop.permute.xlu0 %393  ;;  %v396_v24 = vpop.permute.xlu1 %395  ;;  %338 = vmatprep.mubr.bf16.mxu0 %v1383_v1  ;;  %1303 = vmatprep.mubr.msk.bf16.mxu1 %vm1384_vm0, %v1382_v0 }
  0x92   : > { %v399_v26 = vsel %vm397_vm4, %v392_v22, %v394_v23  ;;  %v400_v27 = vsel %vm397_vm4, %v394_v23, %v396_v24  ;;  %1307 = vmatprep.subr.bf16.mxu1 %v1382_v0 }
  0x93   : > { %1247 = vmatprep.subr.msk.bf16.mxu0 %vm203_vm2, %v399_v26  ;;  %v411_v30 = vsel %vm203_vm2, %v400_v27, 0  ;;  %v1266_v26 = vld [vmem:[%s1569_s1 + $0x1c] sm:$0xf] }
  0x95   : > { %v500_v31 = vpop.permute.xlu0 %499  ;;  %v502_v32 = vpop.permute.xlu1 %501 }
  0x96   : > { %v508_v35 = vsel %vm507_vm5, %v500_v31, %v502_v32 }
  0x97   : > { %1244 = vmatmul.mubr.msk.bf16.vlgmr.msra.gmra.mrb[4].mxu0 %vm199_vm3, %v174_v28  ;;  %1304 = vmatmul.mubr.msk.bf16.vlgmr.msra.gmra.mrb[4].mxu1 %vm199_vm3, %v174_v28  ;;  %v515_v39 = vsel %vm203_vm2, %v508_v35, 0 }
  0x98   : > { %414 = vmatpush1.bf16.msra.mxu0 %v405_v29  ;;  %1308 = vmatpush3.bf16.msra.mxu1 %v411_v30  ;;  %v1270_v29 = vld [vmem:[%s1569_s1 + $0x20] sm:$0xf] }
  0x99   : > { %v504_v33 = vpop.permute.xlu0 %503  ;;  %v506_v34 = vpop.permute.xlu1 %505  ;;  %1309 = vmatprep.mubr.msk.bf16.mxu1 %vm1384_vm0, %v1382_v0  ;;  %445 = vmatprep.mubr.bf16.mxu0 %v1383_v1 }
  0x9a   : > { %v509_v36 = vsel %vm507_vm5, %v502_v32, %v504_v33  ;;  %v510_v37 = vsel %vm507_vm5, %v504_v33, %v506_v34  ;;  %1313 = vmatprep.subr.bf16.mxu1 %v1382_v0 }
  0x9b   : > { %1251 = vmatprep.subr.msk.bf16.mxu0 %vm203_vm2, %v509_v36  ;;  %v521_v40 = vsel %vm203_vm2, %v510_v37, 0 }
  0x9d   : > { %v610_v41 = vpop.permute.xlu0 %609  ;;  %v612_v42 = vpop.permute.xlu1 %611 }
  0x9e   : > { %v618_v45 = vsel %vm617_vm6, %v610_v41, %v612_v42 }
  0x9f   : > { %1248 = vmatmul.mubr.msk.bf16.vlgmr.msra.gmra.mrb[8].mxu0 %vm199_vm3, %v1246_v38  ;;  %1310 = vmatmul.mubr.msk.bf16.vlgmr.msra.gmra.mrb[8].mxu1 %vm199_vm3, %v1246_v38  ;;  %v625_v49 = vsel %vm203_vm2, %v618_v45, 0 }
  0xa0   : > { %524 = vmatpush1.bf16.msra.mxu0 %v515_v39  ;;  %1314 = vmatpush3.bf16.msra.mxu1 %v521_v40 }
  0xa1   : > { %v614_v43 = vpop.permute.xlu0 %613  ;;  %v616_v44 = vpop.permute.xlu1 %615  ;;  %1315 = vmatprep.mubr.msk.bf16.mxu1 %vm1384_vm0, %v1382_v0  ;;  %555 = vmatprep.mubr.bf16.mxu0 %v1383_v1 }
  0xa2   : > { %v619_v46 = vsel %vm617_vm6, %v612_v42, %v614_v43  ;;  %v620_v47 = vsel %vm617_vm6, %v614_v43, %v616_v44  ;;  %1319 = vmatprep.subr.bf16.mxu1 %v1382_v0 }
  0xa3   : > { %1255 = vmatprep.subr.msk.bf16.mxu0 %vm203_vm2, %v619_v46  ;;  %v631_v50 = vsel %vm203_vm2, %v620_v47, 0 }
  0xa5   : > { %v720_v51 = vpop.permute.xlu0 %719  ;;  %v722_v52 = vpop.permute.xlu1 %721 }
  0xa6   : > { %v728_v55 = vsel %vm727_vm7, %v720_v51, %v722_v52 }
  0xa7   : > { %1252 = vmatmul.mubr.msk.bf16.vlgmr.msra.gmra.mrb[12].mxu0 %vm199_vm3, %v1250_v48  ;;  %1316 = vmatmul.mubr.msk.bf16.vlgmr.msra.gmra.mrb[12].mxu1 %vm199_vm3, %v1250_v48  ;;  %v735_v59 = vsel %vm203_vm2, %v728_v55, 0 }
  0xa8   : > { %634 = vmatpush1.bf16.msra.mxu0 %v625_v49  ;;  %1320 = vmatpush3.bf16.msra.mxu1 %v631_v50 }
  0xa9   : > { %v724_v53 = vpop.permute.xlu0 %723  ;;  %v726_v54 = vpop.permute.xlu1 %725  ;;  %1321 = vmatprep.mubr.msk.bf16.mxu1 %vm1384_vm0, %v1382_v0  ;;  %665 = vmatprep.mubr.bf16.mxu0 %v1383_v1 }
  0xaa   : > { %v729_v56 = vsel %vm727_vm7, %v722_v52, %v724_v53  ;;  %v730_v57 = vsel %vm727_vm7, %v724_v53, %v726_v54  ;;  %1325 = vmatprep.subr.bf16.mxu1 %v1382_v0 }
  0xab   : > { %1259 = vmatprep.subr.msk.bf16.mxu0 %vm203_vm2, %v729_v56  ;;  %v741_v60 = vsel %vm203_vm2, %v730_v57, 0 }
  0xad   : > { %v830_v61 = vpop.permute.xlu0 %829  ;;  %v832_v62 = vpop.permute.xlu1 %831 }
  0xae   : > { %v838_v3 = vsel %vm837_vm8, %v830_v61, %v832_v62 }
  0xaf   : > { %1256 = vmatmul.mubr.msk.bf16.vlgmr.msra.gmra.mrb[16].mxu0 %vm199_vm3, %v1254_v58  ;;  %1322 = vmatmul.mubr.msk.bf16.vlgmr.msra.gmra.mrb[16].mxu1 %vm199_vm3, %v1254_v58  ;;  %v845_v7 = vsel %vm203_vm2, %v838_v3, 0 }
  0xb0   : > { %744 = vmatpush1.bf16.msra.mxu0 %v735_v59  ;;  %1326 = vmatpush3.bf16.msra.mxu1 %v741_v60 }
  0xb1   : > { %v834_v63 = vpop.permute.xlu0 %833  ;;  %v836_v2 = vpop.permute.xlu1 %835  ;;  %1327 = vmatprep.mubr.msk.bf16.mxu1 %vm1384_vm0, %v1382_v0  ;;  %775 = vmatprep.mubr.bf16.mxu0 %v1383_v1 }
  0xb2   : > { %v839_v4 = vsel %vm837_vm8, %v832_v62, %v834_v63  ;;  %v840_v5 = vsel %vm837_vm8, %v834_v63, %v836_v2  ;;  %1331 = vmatprep.subr.bf16.mxu1 %v1382_v0 }
  0xb3   : > { %1263 = vmatprep.subr.msk.bf16.mxu0 %vm203_vm2, %v839_v4  ;;  %v851_v8 = vsel %vm203_vm2, %v840_v5, 0 }
  0xb5   : > { %v940_v9 = vpop.permute.xlu0 %939  ;;  %v942_v10 = vpop.permute.xlu1 %941 }
  0xb6   : > { %v948_v13 = vsel %vm947_vm9, %v940_v9, %v942_v10 }
  0xb7   : > { %1260 = vmatmul.mubr.msk.bf16.vlgmr.msra.gmra.mrb[20].mxu0 %vm199_vm3, %v1258_v6  ;;  %1328 = vmatmul.mubr.msk.bf16.vlgmr.msra.gmra.mrb[20].mxu1 %vm199_vm3, %v1258_v6  ;;  %v955_v17 = vsel %vm203_vm2, %v948_v13, 0 }
  0xb8   : > { %854 = vmatpush1.bf16.msra.mxu0 %v845_v7  ;;  %1332 = vmatpush3.bf16.msra.mxu1 %v851_v8 }
  0xb9   : > { %v944_v11 = vpop.permute.xlu0 %943  ;;  %v946_v12 = vpop.permute.xlu1 %945  ;;  %1333 = vmatprep.mubr.msk.bf16.mxu1 %vm1384_vm0, %v1382_v0  ;;  %885 = vmatprep.mubr.bf16.mxu0 %v1383_v1 }
  0xba   : > { %v949_v14 = vsel %vm947_vm9, %v942_v10, %v944_v11  ;;  %v950_v15 = vsel %vm947_vm9, %v944_v11, %v946_v12  ;;  %1337 = vmatprep.subr.bf16.mxu1 %v1382_v0 }
  0xbb   : > { %1267 = vmatprep.subr.msk.bf16.mxu0 %vm203_vm2, %v949_v14  ;;  %v961_v18 = vsel %vm203_vm2, %v950_v15, 0 }
  0xbd   : > { %v1050_v19 = vpop.permute.xlu0 %1049  ;;  %v1052_v20 = vpop.permute.xlu1 %1051 }
  0xbe   : > { %v1058_v23 = vsel %vm1057_vm10, %v1050_v19, %v1052_v20 }
  0xbf   : > { %1264 = vmatmul.mubr.msk.bf16.vlgmr.msra.gmra.mrb[24].mxu0 %vm199_vm3, %v1262_v16  ;;  %1334 = vmatmul.mubr.msk.bf16.vlgmr.msra.gmra.mrb[24].mxu1 %vm199_vm3, %v1262_v16  ;;  %v1065_v27 = vsel %vm203_vm2, %v1058_v23, 0 }
  0xc0   : > { %964 = vmatpush1.bf16.msra.mxu0 %v955_v17  ;;  %1338 = vmatpush3.bf16.msra.mxu1 %v961_v18 }
  0xc1   : > { %v1054_v21 = vpop.permute.xlu0 %1053  ;;  %v1056_v22 = vpop.permute.xlu1 %1055  ;;  %995 = vmatprep.mubr.bf16.mxu0 %v1383_v1  ;;  %1339 = vmatprep.mubr.msk.bf16.mxu1 %vm1384_vm0, %v1382_v0 }
  0xc2   : > { %v1059_v24 = vsel %vm1057_vm10, %v1052_v20, %v1054_v21  ;;  %v1060_v25 = vsel %vm1057_vm10, %v1054_v21, %v1056_v22  ;;  %1343 = vmatprep.subr.bf16.mxu1 %v1382_v0 }
  0xc3   : > { %1271 = vmatprep.subr.msk.bf16.mxu0 %vm203_vm2, %v1059_v24  ;;  %v1071_v28 = vsel %vm203_vm2, %v1060_v25, 0 }
  0xc7   : > { %1268 = vmatmul.mubr.msk.bf16.vlgmr.msra.gmra.mrb[28].mxu0 %vm199_vm3, %v1266_v26  ;;  %1340 = vmatmul.mubr.msk.bf16.vlgmr.msra.gmra.mrb[28].mxu1 %vm199_vm3, %v1266_v26 }
  0xc8   : > { %1074 = vmatpush1.bf16.msra.mxu0 %v1065_v27  ;;  %1344 = vmatpush3.bf16.msra.mxu1 %v1071_v28 }
  0xc9   : > { %1105 = vmatprep.mubr.bf16.mxu0 %v1383_v1  ;;  %1345 = vmatprep.mubr.msk.bf16.mxu1 %vm1384_vm0, %v1382_v0 }
  0xcf   : > { %1272 = vmatmul.mubr.msk.bf16.vlgmr.msra.gmra.mrb[32].mxu0 %vm199_vm3, %v1270_v29  ;;  %1346 = vmatmul.mubr.msk.bf16.vlgmr.msra.gmra.mrb[32].mxu1 %vm199_vm3, %v1270_v29 }
 0x162   : > { %v247_v30 = vpop.f32.mrb[0].mxu0  ;;  %v288_v31 = vpop.f32.mrb[0].mxu1 }
 0x163   : > { %v249_v32 = vpop.f32.mrb[1].mxu0  ;;  %v1299_v33 = vpop.f32.mrb[1].mxu1 }
 0x164   : > { %v251_v34 = vpop.f32.mrb[2].mxu0  ;;  %v291_v35 = vpop.f32.mrb[2].mxu1 }
 0x165   : > { %v252_v36 = vpop.f32.mrb[3].mxu0  ;;  %v1300_v37 = vpop.f32.mrb[3].mxu1 }
 0x16a   : > { %v340_v1 = vpop.f32.mrb[4].mxu0  ;;  %v381_v38 = vpop.f32.mrb[4].mxu1 }
 0x16b   : > { %v341_v39 = vadd.f32 %v340_v1, %v247_v30  ;;  %v382_v0 = vadd.f32 %v381_v38, %v288_v31  ;;  %v342_v40 = vpop.f32.mrb[5].mxu0  ;;  %v1305_v41 = vpop.f32.mrb[5].mxu1 }
 0x16c   : > { %v343_v42 = vadd.f32 %v342_v40, %v249_v32  ;;  %v344_v43 = vpop.f32.mrb[6].mxu0  ;;  %v384_v44 = vpop.f32.mrb[6].mxu1 }
 0x16d   : > { %v345_v45 = vpop.f32.mrb[7].mxu0  ;;  %v1306_v46 = vpop.f32.mrb[7].mxu1 }
 0x172   : > { %v447_v47 = vpop.f32.mrb[8].mxu0  ;;  %v488_v48 = vpop.f32.mrb[8].mxu1 }
 0x173   : > { %v494_v49 = vadd.f32 %v447_v47, %v341_v39  ;;  %v496_v50 = vadd.f32 %v488_v48, %v382_v0  ;;  %v449_v51 = vpop.f32.mrb[9].mxu0  ;;  %v1311_v52 = vpop.f32.mrb[9].mxu1 }
 0x174   : > { %v495_v53 = vadd.f32 %v449_v51, %v343_v42  ;;  %v451_v54 = vpop.f32.mrb[10].mxu0  ;;  %v491_v55 = vpop.f32.mrb[10].mxu1 }
 0x175   : > { %v452_v56 = vpop.f32.mrb[11].mxu0  ;;  %v1312_v57 = vpop.f32.mrb[11].mxu1 }
 0x17a   : > { %v557_v58 = vpop.f32.mrb[12].mxu0  ;;  %v598_v59 = vpop.f32.mrb[12].mxu1 }
 0x17b   : > { %v604_v60 = vadd.f32 %v557_v58, %v494_v49  ;;  %v606_v61 = vadd.f32 %v598_v59, %v496_v50  ;;  %v559_v62 = vpop.f32.mrb[13].mxu0  ;;  %v1317_v63 = vpop.f32.mrb[13].mxu1 }
 0x17c   : > { %v605_v2 = vadd.f32 %v559_v62, %v495_v53  ;;  %v561_v3 = vpop.f32.mrb[14].mxu0  ;;  %v601_v4 = vpop.f32.mrb[14].mxu1 }
 0x17d   : > { %v562_v5 = vpop.f32.mrb[15].mxu0  ;;  %v1318_v6 = vpop.f32.mrb[15].mxu1 }
 0x17e   : > { %v1161_v49 = vpop.permute.xlu0 %1160 }
 0x182   : > { %v667_v7 = vpop.f32.mrb[16].mxu0  ;;  %v708_v8 = vpop.f32.mrb[16].mxu1 }
 0x183   : > { %v714_v9 = vadd.f32 %v667_v7, %v604_v60  ;;  %v716_v10 = vadd.f32 %v708_v8, %v606_v61  ;;  %v669_v11 = vpop.f32.mrb[17].mxu0  ;;  %v1323_v12 = vpop.f32.mrb[17].mxu1 }
 0x184   : > { %v715_v13 = vadd.f32 %v669_v11, %v605_v2  ;;  %v671_v14 = vpop.f32.mrb[18].mxu0  ;;  %v711_v15 = vpop.f32.mrb[18].mxu1 }
 0x185   : > { %v672_v16 = vpop.f32.mrb[19].mxu0  ;;  %v1324_v17 = vpop.f32.mrb[19].mxu1 }
 0x18a   : > { %v777_v18 = vpop.f32.mrb[20].mxu0  ;;  %v818_v19 = vpop.f32.mrb[20].mxu1 }
 0x18b   : > { %v824_v20 = vadd.f32 %v777_v18, %v714_v9  ;;  %v826_v21 = vadd.f32 %v818_v19, %v716_v10  ;;  %v779_v22 = vpop.f32.mrb[21].mxu0  ;;  %v1329_v23 = vpop.f32.mrb[21].mxu1 }
 0x18c   : > { %v825_v24 = vadd.f32 %v779_v22, %v715_v13  ;;  %v781_v25 = vpop.f32.mrb[22].mxu0  ;;  %v821_v26 = vpop.f32.mrb[22].mxu1 }
 0x18d   : > { %v782_v27 = vpop.f32.mrb[23].mxu0  ;;  %v1330_v28 = vpop.f32.mrb[23].mxu1 }
 0x192   : > { %v887_v29 = vpop.f32.mrb[24].mxu0  ;;  %v928_v30 = vpop.f32.mrb[24].mxu1 }
 0x193   : > { %v934_v31 = vadd.f32 %v887_v29, %v824_v20  ;;  %v936_v32 = vadd.f32 %v928_v30, %v826_v21  ;;  %v889_v33 = vpop.f32.mrb[25].mxu0  ;;  %v1335_v34 = vpop.f32.mrb[25].mxu1 }
 0x194   : > { %v935_v35 = vadd.f32 %v889_v33, %v825_v24  ;;  %v891_v36 = vpop.f32.mrb[26].mxu0  ;;  %v931_v37 = vpop.f32.mrb[26].mxu1 }
 0x195   : > { %v892_v1 = vpop.f32.mrb[27].mxu0  ;;  %v1336_v38 = vpop.f32.mrb[27].mxu1 }
 0x19a   : > { %v997_v39 = vpop.f32.mrb[28].mxu0  ;;  %v1038_v0 = vpop.f32.mrb[28].mxu1 }
 0x19b   : > { %v1044_v40 = vadd.f32 %v997_v39, %v934_v31  ;;  %v1046_v41 = vadd.f32 %v1038_v0, %v936_v32  ;;  %v999_v42 = vpop.f32.mrb[29].mxu0  ;;  %v1341_v43 = vpop.f32.mrb[29].mxu1 }
 0x19c   : > { %v1045_v44 = vadd.f32 %v999_v42, %v935_v35  ;;  %v1001_v45 = vpop.f32.mrb[30].mxu0  ;;  %v1041_v46 = vpop.f32.mrb[30].mxu1 }
 0x19d   : > { %v1002_v47 = vpop.f32.mrb[31].mxu0  ;;  %v1342_v48 = vpop.f32.mrb[31].mxu1 }
 0x1a2   : > { %v1107_v50 = vpop.f32.mrb[32].mxu0  ;;  %v1148_v51 = vpop.f32.mrb[32].mxu1 }
 0x1a3   : > { %v1154_v52 = vadd.f32 %v1107_v50, %v1044_v40  ;;  %v1156_v53 = vadd.f32 %v1148_v51, %v1046_v41  ;;  %v1109_v54 = vpop.f32.mrb[33].mxu0  ;;  %v1347_v55 = vpop.f32.mrb[33].mxu1 }
 0x1a4   : > { %v1155_v56 = vadd.f32 %v1109_v54, %v1045_v44  ;;  %v1151_v57 = vpop.f32.mrb[34].mxu1  ;;  %v1111_v58 = vpop.f32.mrb[34].mxu0 }
 0x1a5   : > { %v1163_v59 = vadd.f32 %v1161_v49, %v1154_v52  ;;  %v1165_v60 = vadd.f32 %v1161_v49, %v1156_v53  ;;  %v1112_v61 = vpop.f32.mrb[35].mxu0  ;;  %v1348_v62 = vpop.f32.mrb[35].mxu1 }
 0x1a6   : > { %v1164_v63 = vadd.f32 %v1161_v49, %v1155_v56 }
 0x1a7   : > { %v1166_v2 = vmax.f32 %v1163_v59, 0.0  ;;  %v1168_v3 = vmax.f32 %v1165_v60, 0.0 }
 0x1a8   : > { %v1167_v4 = vmax.f32 %v1164_v63, 0.0 }
 0x1a9   : > { %1169 = vst [vmem:[%s170_s24] sm:$0xff] %v1166_v2  ;;  %1171 = vst [vmem:[%s170_s24 + $0x10] sm:$0xff] %v1168_v3 }
 0x1aa   : > { %1170 = vst [vmem:[%s170_s24 + $0x8] sm:$0xff] %v1167_v4 }
 0x1ab PF: > { %s13_s12 = sadd.s32 1, %s1380_s12  }
 0x1ac   : > { %p10_p4 = scmp.ge.s32.totalorder %s13_s12, 4  }
 0x1ae   :  { %12 = sbr.rel (!%p10_p4) target bundleno = 1 (0x1), region = 70 }

</bundles_post_ra>
